<compile_context>
chip_gen: v5e
topology: v5e:2x2
jax: 0.10.0
libtpu: 0.0.40
codegen_flags: <defaults>
</compile_context>

<pallas_src>
import functools

import jax
import jax.numpy as jnp
from jax.experimental import pallas as pl
from jax.experimental.pallas import tpu as pltpu

_LANE = 128


def _round_up(x, m):
    return (x + m - 1) // m * m


def _sublane_unit(dtype):
    # f32 -> 8 rows per sublane tile, bf16 -> 16, int8/fp8 -> 32.
    return max(8, 32 // jnp.dtype(dtype).itemsize)


def _vmem_budget_and_limit():
    """Generation-aware working-set budget and scoped-VMEM limit (bytes)."""
    cap = None
    try:
        info = pltpu.get_tpu_info()
        cap = getattr(info, "vmem_capacity_bytes", None)
    except Exception:
        cap = None
    if not cap:
        cap = 64 * 1024 * 1024  # conservative fallback: fits every generation
    budget = int(cap * 0.72)    # ~92 MiB on v5e/v6e (128 MiB), ~46 MiB on v7x (64 MiB)
    limit = int(cap * 0.80)     # explicit scoped-VMEM limit for Mosaic
    return budget, limit


def merge_layer_kernel(x1_ref, x2_ref, w1a_ref, w1b_ref, b1_ref, w2_ref,
                       b2_ref, o_ref, *, d4):
    # h = relu([x1, x2] @ W1 + b1), concat fused as two partial matmuls.
    h = jnp.dot(x1_ref[...], w1a_ref[...], preferred_element_type=jnp.float32)
    h = h + jnp.dot(x2_ref[...], w1b_ref[...], preferred_element_type=jnp.float32)
    h = jnp.maximum(h + b1_ref[...], 0.0)                     # f32 bias + ReLU
    out = jnp.dot(h.astype(w2_ref.dtype), w2_ref[...],
                  preferred_element_type=jnp.float32)
    # Store only the real dim4 columns: output is unpadded (compact) in HBM.
    o_ref[...] = (out[:, :d4] + b2_ref[:, :d4]).astype(o_ref.dtype)


def prepare_merge_layer_params(w1, b1, w2, b2, dim1, compute_dtype=jnp.bfloat16):
    """w1: (dim1+dim2, dim3), w2: (dim3, dim4) in [in, out] layout.

    Splits W1 at the concat boundary and zero-pads dim3/dim4 to multiples of
    128 so the MXU sees full-lane tiles.  compute_dtype=bf16 (default) halves
    weight/activation HBM traffic on v5e/v6e/v7x; accumulation stays f32.
    Pass compute_dtype=jnp.float32 for bit-accurate f32.
    """
    din, d3 = w1.shape
    d3b, d4 = w2.shape
    assert d3b == d3 and 0 < dim1 < din
    d3p = _round_up(d3, _LANE)
    d4p = _round_up(d4, _LANE)
    w1 = w1.astype(compute_dtype)
    w2 = w2.astype(compute_dtype)
    w1p = jnp.pad(w1, ((0, 0), (0, d3p - d3)))
    w2p = jnp.pad(w2, ((0, d3p - d3), (0, d4p - d4)))
    b1p = jnp.pad(b1.astype(jnp.float32), (0, d3p - d3)).reshape(1, d3p)
    b2p = jnp.pad(b2.astype(jnp.float32), (0, d4p - d4)).reshape(1, d4p)
    return {"w1a": w1p[:dim1], "w1b": w1p[dim1:], "b1": b1p,
            "w2": w2p, "b2": b2p, "d4": d4}


def _pick_tile_b(B, d1, d2, d3p, d4p, d4, act_bytes, out_bytes, sublane, budget):
    # Grid-invariant weights + f32 biases; default pipelining double-buffers
    # them in VMEM even though their DMA only happens once.
    weight_bytes = ((d1 + d2) * d3p + d3p * d4p) * act_bytes + (d3p + d4p) * 4
    resident = 2 * weight_bytes
    if resident > int(0.8 * budget):
        # TODO(synk): tile d3/d4 with an 'arbitrary' grid axis + VMEM accumulator
        # for very large hidden dims instead of refusing.
        raise ValueError(
            f"MergeLayer weights ({resident / 2**20:.1f} MiB double-buffered) do "
            f"not fit the VMEM budget ({budget / 2**20:.1f} MiB); add K/N tiling.")
    # Per batch row: double-buffered x1/x2 inputs + compact output tiles,
    # plus the f32 h/out intermediates.
    per_row = (2 * (d1 + d2) * act_bytes + 2 * d4 * out_bytes
               + (d3p + d4p) * 4)
    avail = budget - resident
    tile = min(avail // per_row, 4096, _round_up(B, sublane))
    return int(max(sublane, (tile // sublane) * sublane))


def merge_layer_forward(x1, x2, params, *, tile_b=None, out_dtype=None):
    """x1: (B, dim1), x2: (B, dim2) -> (B, dim4)."""
    w1a, w1b = params["w1a"], params["w1b"]
    b1, w2, b2, d4 = params["b1"], params["w2"], params["b2"], params["d4"]
    B, d1 = x1.shape
    B2, d2 = x2.shape
    assert B == B2 and d1 == w1a.shape[0] and d2 == w1b.shape[0]
    d3p, d4p = w2.shape

    compute_dtype = w1a.dtype
    if out_dtype is None:
        out_dtype = x1.dtype
    x1 = x1.astype(compute_dtype)
    x2 = x2.astype(compute_dtype)

    act_bytes = jnp.dtype(compute_dtype).itemsize
    out_bytes = jnp.dtype(out_dtype).itemsize
    sublane = _sublane_unit(compute_dtype)
    budget, vmem_limit = _vmem_budget_and_limit()

    if tile_b is None:
        tile_b = _pick_tile_b(B, d1, d2, d3p, d4p, d4, act_bytes, out_bytes,
                              sublane, budget)
    else:
        tile_b = max(sublane, _round_up(int(tile_b), sublane))
    tile_b = int(min(tile_b, _round_up(B, sublane)))

    # No batch padding: cdiv grid; the boundary block (if any) is partial and
    # its out-of-range rows are masked on writeback by Pallas.
    grid = (pl.cdiv(B, tile_b),)

    flops = 2 * B * ((d1 + d2) * d3p + d3p * d4p)
    bytes_accessed = (B * (d1 + d2) * act_bytes                     # x1/x2 reads
                      + B * d4 * out_bytes                          # compact output
                      + ((d1 + d2) * d3p + d3p * d4p) * act_bytes   # weights
                      + (d3p + d4p) * 4)                            # f32 biases
    cost = pl.CostEstimate(flops=flops, transcendentals=0,
                           bytes_accessed=bytes_accessed)

    kernel = functools.partial(merge_layer_kernel, d4=d4)

    # TODO(synk): on v7x, place the grid-invariant weights in VMEM_SHARED so the
    # two TensorCores share a single copy instead of one per core.
    out = pl.pallas_call(
        kernel,
        out_shape=jax.ShapeDtypeStruct((B, d4), out_dtype),
        grid_spec=pltpu.PrefetchScalarGridSpec(
            num_scalar_prefetch=0,
            grid=grid,
            in_specs=[
                pl.BlockSpec((tile_b, d1), lambda i: (i, 0)),   # x1 tile
                pl.BlockSpec((tile_b, d2), lambda i: (i, 0)),   # x2 tile
                pl.BlockSpec((d1, d3p), lambda i: (0, 0)),      # W1a (grid-invariant)
                pl.BlockSpec((d2, d3p), lambda i: (0, 0)),      # W1b (grid-invariant)
                pl.BlockSpec((1, d3p), lambda i: (0, 0)),       # b1 (f32)
                pl.BlockSpec((d3p, d4p), lambda i: (0, 0)),     # W2 (grid-invariant)
                pl.BlockSpec((1, d4p), lambda i: (0, 0)),       # b2 (f32)
            ],
            out_specs=pl.BlockSpec((tile_b, d4), lambda i: (i, 0)),
        ),
        compiler_params=pltpu.CompilerParams(
            dimension_semantics=("parallel",),
            vmem_limit_bytes=vmem_limit),
        cost_estimate=cost,
    )(x1, x2, w1a, w1b, b1, w2, b2)
    return out


def init_merge_layer_params(key, dim1, dim2, dim3, dim4, dtype=jnp.float32):
    """Synthetic init matching PyTorch MergeLayer (weights returned as [in, out])."""
    k1, k2, k3, k4 = jax.random.split(key, 4)
    din = dim1 + dim2
    std1 = (2.0 / (din + dim3)) ** 0.5      # xavier_normal_
    std2 = (2.0 / (dim3 + dim4)) ** 0.5
    w1 = (jax.random.normal(k1, (din, dim3)) * std1).astype(dtype)
    w2 = (jax.random.normal(k2, (dim3, dim4)) * std2).astype(dtype)
    bnd1 = 1.0 / (din ** 0.5)               # PyTorch Linear default bias init
    bnd2 = 1.0 / (dim3 ** 0.5)
    b1 = jax.random.uniform(k3, (dim3,), minval=-bnd1, maxval=bnd1).astype(dtype)
    b2 = jax.random.uniform(k4, (dim4,), minval=-bnd2, maxval=bnd2).astype(dtype)
    return w1, b1, w2, b2


if __name__ == "__main__":
    key = jax.random.PRNGKey(0)
    kx1, kx2, kp = jax.random.split(key, 3)

    dim1, dim2, dim3, dim4 = 16, 16, 32, 8
    w1, b1, w2, b2 = init_merge_layer_params(kp, dim1, dim2, dim3, dim4)

    # --- f32 compute path: strict numerical check; B=20 with tile_b=8 gives a
    #     multi-step grid with a partial last block (exercises the cdiv grid).
    B = 20
    x1 = jax.random.normal(kx1, (B, dim1), dtype=jnp.float32)
    x2 = jax.random.normal(kx2, (B, dim2), dtype=jnp.float32)
    params_f32 = prepare_merge_layer_params(w1, b1, w2, b2, dim1,
                                            compute_dtype=jnp.float32)
    out = jax.block_until_ready(merge_layer_forward(x1, x2, params_f32, tile_b=8))

    x = jnp.concatenate([x1, x2], axis=1)
    ref = jnp.maximum(x @ w1 + b1, 0.0) @ w2 + b2
    assert out.shape == (B, dim4)
    assert jnp.allclose(out, ref, atol=1e-4, rtol=1e-4)

    # --- default bf16 compute path (recommended on v6e/v7x): loose tolerance.
    B2 = 32
    x1b = jax.random.normal(kx1, (B2, dim1), dtype=jnp.float32)
    x2b = jax.random.normal(kx2, (B2, dim2), dtype=jnp.float32)
    params_bf16 = prepare_merge_layer_params(w1, b1, w2, b2, dim1)  # bf16 default
    out_b = jax.block_until_ready(merge_layer_forward(x1b, x2b, params_bf16))

    xb = jnp.concatenate([x1b, x2b], axis=1)
    ref_b = jnp.maximum(xb @ w1 + b1, 0.0) @ w2 + b2
    assert out_b.shape == (B2, dim4)
    assert jnp.allclose(out_b, ref_b, atol=5e-2, rtol=5e-2)

    print("KERNEL_OK")
</pallas_src>

<mosaic_0001>
module attributes {stable_mosaic.version = 11 : i64} {
  func.func @merge_layer_kernel(%arg0: i32, %arg1: memref<8x16xf32, #tpu.memory_space<vmem>>, %arg2: memref<8x16xf32, #tpu.memory_space<vmem>>, %arg3: memref<16x128xf32, #tpu.memory_space<vmem>>, %arg4: memref<16x128xf32, #tpu.memory_space<vmem>>, %arg5: memref<1x128xf32, #tpu.memory_space<vmem>>, %arg6: memref<128x128xf32, #tpu.memory_space<vmem>>, %arg7: memref<1x128xf32, #tpu.memory_space<vmem>>, %arg8: memref<8x8xf32, #tpu.memory_space<vmem>>) attributes {dimension_semantics = [#tpu.dimension_semantics<parallel>], iteration_bounds = array<i64: 3>, scalar_prefetch = 0 : i64, scratch_operands = 0 : i64, tpu.core_type = #tpu.core_type<tc>, window_params = [{transform_indices = @transform_0, window_bounds = array<i64: 8, 16>}, {transform_indices = @transform_1, window_bounds = array<i64: 8, 16>}, {pipeline_mode = #tpu.pipeline_mode<synchronous>, transform_indices = @transform_2, window_bounds = array<i64: 16, 128>}, {pipeline_mode = #tpu.pipeline_mode<synchronous>, transform_indices = @transform_3, window_bounds = array<i64: 16, 128>}, {pipeline_mode = #tpu.pipeline_mode<synchronous>, transform_indices = @transform_4, window_bounds = array<i64: 1, 128>}, {pipeline_mode = #tpu.pipeline_mode<synchronous>, transform_indices = @transform_5, window_bounds = array<i64: 128, 128>}, {pipeline_mode = #tpu.pipeline_mode<synchronous>, transform_indices = @transform_6, window_bounds = array<i64: 1, 128>}, {transform_indices = @transform_7, window_bounds = array<i64: 8, 8>}]} {
    %c0 = arith.constant 0 : index
    %c0_0 = arith.constant 0 : index
    %0 = vector.load %arg1[%c0, %c0_0] : memref<8x16xf32, #tpu.memory_space<vmem>>, vector<8x16xf32>
    %c0_1 = arith.constant 0 : index
    %c0_2 = arith.constant 0 : index
    %1 = vector.load %arg3[%c0_1, %c0_2] : memref<16x128xf32, #tpu.memory_space<vmem>>, vector<16x128xf32>
    %cst = arith.constant dense<0.000000e+00> : vector<8x128xf32>
    %2 = tpu.matmul %0, %1, %cst {dimension_numbers = #tpu.dot_dimension_numbers<[1], [0], [0], [1], [0, 0, 1, 1], [], []>} : vector<8x16xf32>, vector<16x128xf32>, vector<8x128xf32> -> vector<8x128xf32>
    %c0_3 = arith.constant 0 : index
    %c0_4 = arith.constant 0 : index
    %3 = vector.load %arg2[%c0_3, %c0_4] : memref<8x16xf32, #tpu.memory_space<vmem>>, vector<8x16xf32>
    %c0_5 = arith.constant 0 : index
    %c0_6 = arith.constant 0 : index
    %4 = vector.load %arg4[%c0_5, %c0_6] : memref<16x128xf32, #tpu.memory_space<vmem>>, vector<16x128xf32>
    %cst_7 = arith.constant dense<0.000000e+00> : vector<8x128xf32>
    %5 = tpu.matmul %3, %4, %cst_7 {dimension_numbers = #tpu.dot_dimension_numbers<[1], [0], [0], [1], [0, 0, 1, 1], [], []>} : vector<8x16xf32>, vector<16x128xf32>, vector<8x128xf32> -> vector<8x128xf32>
    %6 = arith.addf %2, %5 : vector<8x128xf32>
    %c0_8 = arith.constant 0 : index
    %c0_9 = arith.constant 0 : index
    %7 = vector.load %arg5[%c0_8, %c0_9] : memref<1x128xf32, #tpu.memory_space<vmem>>, vector<1x128xf32>
    %8 = vector.broadcast %7 : vector<1x128xf32> to vector<8x128xf32>
    %9 = arith.addf %6, %8 : vector<8x128xf32>
    %cst_10 = arith.constant 0.000000e+00 : f32
    %10 = vector.broadcast %cst_10 : f32 to vector<8x128xf32>
    %11 = arith.maximumf %9, %10 : vector<8x128xf32>
    %c0_11 = arith.constant 0 : index
    %c0_12 = arith.constant 0 : index
    %12 = vector.load %arg6[%c0_11, %c0_12] : memref<128x128xf32, #tpu.memory_space<vmem>>, vector<128x128xf32>
    %cst_13 = arith.constant dense<0.000000e+00> : vector<8x128xf32>
    %13 = tpu.matmul %11, %12, %cst_13 {dimension_numbers = #tpu.dot_dimension_numbers<[1], [0], [0], [1], [0, 0, 1, 1], [], []>} : vector<8x128xf32>, vector<128x128xf32>, vector<8x128xf32> -> vector<8x128xf32>
    %14 = vector.extract_strided_slice %13 {offsets = [0, 0], sizes = [8, 8], strides = [1, 1]} : vector<8x128xf32> to vector<8x8xf32>
    %c0_14 = arith.constant 0 : index
    %c0_15 = arith.constant 0 : index
    %15 = vector.load %arg7[%c0_14, %c0_15] : memref<1x128xf32, #tpu.memory_space<vmem>>, vector<1x8xf32>
    %16 = vector.broadcast %15 : vector<1x8xf32> to vector<8x8xf32>
    %17 = arith.addf %14, %16 : vector<8x8xf32>
    %c0_16 = arith.constant 0 : index
    %c0_17 = arith.constant 0 : index
    %18 = vector.load %arg8[%c0_16, %c0_17] : memref<8x8xf32, #tpu.memory_space<vmem>>, vector<8x8xf32>
    tpu.vector_store %arg8[%c0_16, %c0_17], %17 {strides = array<i32>} : memref<8x8xf32, #tpu.memory_space<vmem>>, vector<8x8xf32>,
    return
  }
  func.func @transform_0(%arg0: i32) -> (i32, i32) {
    %c0_i32 = arith.constant 0 : i32
    %c0_i32_0 = arith.constant 0 : i32
    return %arg0, %c0_i32 : i32, i32
  }
  func.func @transform_1(%arg0: i32) -> (i32, i32) {
    %c0_i32 = arith.constant 0 : i32
    %c0_i32_0 = arith.constant 0 : i32
    return %arg0, %c0_i32 : i32, i32
  }
  func.func @transform_2(%arg0: i32) -> (i32, i32) {
    %c0_i32 = arith.constant 0 : i32
    %c0_i32_0 = arith.constant 0 : i32
    %c0_i32_1 = arith.constant 0 : i32
    return %c0_i32, %c0_i32_0 : i32, i32
  }
  func.func @transform_3(%arg0: i32) -> (i32, i32) {
    %c0_i32 = arith.constant 0 : i32
    %c0_i32_0 = arith.constant 0 : i32
    %c0_i32_1 = arith.constant 0 : i32
    return %c0_i32, %c0_i32_0 : i32, i32
  }
  func.func @transform_4(%arg0: i32) -> (i32, i32) {
    %c0_i32 = arith.constant 0 : i32
    %c0_i32_0 = arith.constant 0 : i32
    %c0_i32_1 = arith.constant 0 : i32
    return %c0_i32, %c0_i32_0 : i32, i32
  }
  func.func @transform_5(%arg0: i32) -> (i32, i32) {
    %c0_i32 = arith.constant 0 : i32
    %c0_i32_0 = arith.constant 0 : i32
    %c0_i32_1 = arith.constant 0 : i32
    return %c0_i32, %c0_i32_0 : i32, i32
  }
  func.func @transform_6(%arg0: i32) -> (i32, i32) {
    %c0_i32 = arith.constant 0 : i32
    %c0_i32_0 = arith.constant 0 : i32
    %c0_i32_1 = arith.constant 0 : i32
    return %c0_i32, %c0_i32_0 : i32, i32
  }
  func.func @transform_7(%arg0: i32) -> (i32, i32) {
    %c0_i32 = arith.constant 0 : i32
    %c0_i32_0 = arith.constant 0 : i32
    return %arg0, %c0_i32 : i32, i32
  }
}

</mosaic_0001>

<bundles_post_ra>
// kernel: tpu_custom_call.1
= control target key start
LH: loop header
LB: loop body
LE: loop exit
PB: predicated region body
PF: predicated region fallthrough
CT: control target
= control target key end

     0   :  { %12 = vsyncpa [#allocation3], 0  ;;  %s609_s24 = smov 0   ;;  %s655_s0 = inlined_call_operand.vmem [shape: f32[20,16], index: 0, kind: input, shape index: {}]   ;;  %s656_s1 = inlined_call_operand.vmem [shape: f32[20,16], index: 1, kind: input, shape index: {}]   ;;  %s657_s2 = inlined_call_operand.vmem [shape: f32[16,128], index: 2, kind: input, shape index: {}]   ;;  %s658_s3 = inlined_call_operand.vmem [shape: f32[16,128], index: 3, kind: input, shape index: {}]   ;;  %s659_s4 = inlined_call_operand.vmem [shape: f32[1,128], index: 4, kind: input, shape index: {}]   ;;  %s660_s5 = inlined_call_operand.hbm [shape: f32[128,128], index: 5, kind: input, shape index: {}]   ;;  %s661_s6 = inlined_call_operand.vmem [shape: f32[1,128], index: 6, kind: input, shape index: {}]   ;;  %s662_s7 = inlined_call_operand.vmem [shape: f32[20,8], index: 7, kind: output, shape index: {}]  }
   0x1 LB: > { %s226_s27 = sshll.u32 %s660_s5, 4  ;;  %s487_s28 = sadd.s32 4294967295, %s564_s24   ;;  %s564_s24 = sphi %s609_s24, %s18_s24   ;;  %s227_s27 = int_to_ptr.hbm [resolvable:$true] %s226_s27 }
   0x2   : > { %p489_p0 = scmp.ge.s32.totalorder %s564_s24, 1  ;;  %p206_p1 = scmp.lt.s32.totalorder %s564_s24, 4 }
   0x3   : > { %p509_p2 = scmp.eq.s32.totalorder %s487_s28, 0  ;;  %s566_s29 = smov [#allocation2]  }
   0x4   : > { %p207_p3 = pnand %p489_p0, %p206_p1  ;;  %s228_s30 = sshll.u32 %s566_s29, 4  ;;  %s229_s30 = int_to_ptr.vmem [resolvable:$true] %s228_s30 }
   0x5   : > { %s567_s8 = smov 128   ;;  %s568_s9 = smov 8  }
   0x6   : > { %p505_p4 = pneg %p207_p3  ;;  %261 = sbr.rel (%p207_p3) target bundleno = 286 (0x11e), region = 48 }
   0x8   : > { %p506_p5 = pnand %p509_p2, %p505_p4 }
   0xa   : > { %508 = dma.hbm_to_vmem [thread:$0]  (!%p506_p5), %s227_s27, 2048, %s229_s30, [#allocation3], %s567_s8, %s567_s8, %s568_s9  }
   0xb   : > { %559 = dma.done.wait (%p509_p2), [#allocation3], 2048  }
   0xc   : > { %561 = vsyncadd (%p509_p2), [#allocation3], 4294965248  ;;  %p296_p6 = scmp.lt.s32.totalorder %s487_s28, 2  ;;  %v313_v0 = vld [vmem:[%s658_s3 + $0x8] sm:$0xff]  ;;  %v312_v2 = vld [vmem:[%s658_s3] sm:$0xff]  ;;  %vm314_vm0 = vcmask 130048  }
   0xd   : > { %v310_v1 = vld [vmem:[%s657_s2 + $0x8] sm:$0xff]  ;;  %332 = vmatpush.msra.mxu0 %v313_v0  ;;  %v309_v3 = vld [vmem:[%s657_s2] sm:$0xff]  ;;  %v382_v6 = vld [vmem:[#allocation2 + $0x78] sm:$0xff]  ;;  %vm408_vm1 = vcmask 64512  }
   0xe   : > { %s664_s28 = smov (!%p296_p6, %s487_s28), 2  ;;  %355 = vmatpush.msra.mxu1 %v310_v1  ;;  %v381_v7 = vld [vmem:[#allocation2 + $0x70] sm:$0xff]  ;;  %383 = vmatpush.msra.mxu2 %v382_v6  ;;  %v380_v8 = vld [vmem:[#allocation2 + $0x68] sm:$0xff]  ;;  %v379_v9 = vld [vmem:[#allocation2 + $0x60] sm:$0xff] }
   0xf   : > { %s620_s10 = sshll.u32 %s664_s28, 3  ;;  %333 = vmatpush.msra.mxu0 %v312_v2  ;;  %v378_v10 = vld [vmem:[#allocation2 + $0x58] sm:$0xff]  ;;  %v377_v11 = vld [vmem:[#allocation2 + $0x50] sm:$0xff]  ;;  %v376_v12 = vld [vmem:[#allocation2 + $0x48] sm:$0xff] }
  0x10   : > { %s303_s13 = scalar_lea.vmem %s656_s1, %s620_s10  ;;  %s299_s16 = scalar_lea.vmem %s655_s0, %s620_s10  ;;  %356 = vmatpush.msra.mxu1 %v309_v3  ;;  %384 = vmatpush.msra.mxu2 %v381_v7  ;;  %v375_v13 = vld [vmem:[#allocation2 + $0x40] sm:$0xff]  ;;  %v374_v14 = vld [vmem:[#allocation2 + $0x38] sm:$0xff]  ;;  %v373_v15 = vld [vmem:[#allocation2 + $0x30] sm:$0xff] }
  0x11   : > { %v311_v4 = vld [vmem:[%s303_s13] sm:$0xff]  ;;  %v372_v16 = vld [vmem:[#allocation2 + $0x28] sm:$0xff]  ;;  %v370_v18 = vld [vmem:[#allocation2 + $0x18] sm:$0xff]  ;;  %s307_s9 = scalar_lea.vmem %s662_s7, %s620_s10 }
  0x12   : > { %v308_v5 = vld [vmem:[%s299_s16] sm:$0xff]  ;;  %497 = vmatmul.msk.f32.vlgmr.msra.gmra.mxu0 %vm314_vm0, %v311_v4  ;;  %385 = vmatpush.msra.mxu2 %v380_v8  ;;  %v369_v19 = vld [vmem:[#allocation2 + $0x10] sm:$0xff]  ;;  %v368_v20 = vld [vmem:[#allocation2 + $0x8] sm:$0xff] }
  0x13   : > { %498 = vmatmul.msk.f32.vlgmr.msra.gmra.mxu1 %vm314_vm0, %v308_v5  ;;  %v371_v17 = vld [vmem:[#allocation2 + $0x20] sm:$0xff] }
  0x14   : > { %386 = vmatpush.msra.mxu2 %v379_v9  ;;  %v367_v21 = vld [vmem:[#allocation2] sm:$0xff] }
  0x15   : > { %v522_v22 = vld [vmem:[%s659_s4] ss:$0 sm:$0xff] }
  0x16   : > { %387 = vmatpush.msra.mxu2 %v378_v10  ;;  %v523_v28 = vld [vmem:[%s661_s6] ss:$0 sm:$0xff] }
  0x18   : > { %388 = vmatpush.msra.mxu2 %v377_v11 }
  0x1a   : > { %389 = vmatpush.msra.mxu2 %v376_v12 }
  0x1c   : > { %390 = vmatpush.msra.mxu2 %v375_v13 }
  0x1e   : > { %391 = vmatpush.msra.mxu2 %v374_v14 }
  0x20   : > { %392 = vmatpush.msra.mxu2 %v373_v15 }
  0x22   : > { %393 = vmatpush.msra.mxu2 %v372_v16 }
  0x24   : > { %394 = vmatpush.msra.mxu2 %v371_v17 }
  0x26   : > { %395 = vmatpush.msra.mxu2 %v370_v18 }
  0x28   : > { %396 = vmatpush.msra.mxu2 %v369_v19 }
  0x2a   : > { %397 = vmatpush.msra.mxu2 %v368_v20 }
  0x2c   : > { %398 = vmatpush.msra.mxu2 %v367_v21 }
  0x8f   : > { %v335_v23 = vpop.f32.mrf.mxu0 }
  0x90   : > { %v358_v24 = vpop.f32.mrf.mxu1 }
  0x91   : > { %v359_v25 = vadd.f32 %v358_v24, %v335_v23 }
  0x93   : > { %v365_v26 = vadd.f32 %v522_v22, %v359_v25 }
  0x95   : > { %v366_v27 = vmax.f32 %v365_v26, 0.0 }
  0x97   : > { %399 = vmatmul.f32.vlgmr.msra.gmra.mxu2 %v366_v27 }
 0x11a   : > { %v400_v29 = vpop.f32.mrf.mxu2 }
 0x11b   : > { %v407_v30 = vadd.f32 %v523_v28, %v400_v29 }
 0x11d   : > { %409 = vst.msk [vmem:[%s307_s9] sm:$0xff] %vm408_vm1, %v407_v30 }
 0x11e PF: > { %s18_s24 = sadd.s32 1, %s564_s24  }
 0x11f   : > { %p15_p7 = scmp.ge.s32.totalorder %s18_s24, 5  }
 0x121   :  { %17 = sbr.rel (!%p15_p7) target bundleno = 1 (0x1), region = 86 }
 0x126   :  { %429 = vsyncpa [#allocation3], 1 }
 0x127   :  { %431 = vsyncpa [#allocation3 + $0x1], 1 }

</bundles_post_ra>
